<compile_context>
chip_gen: v5e
topology: v5e:2x2
jax: 0.10.0
libtpu: 0.0.40
codegen_flags: <defaults>
</compile_context>

<pallas_src>
import jax
import jax.numpy as jnp
from jax.experimental import pallas as pl
from jax.experimental.pallas import tpu as pltpu

LANE = 128          # TPU lane width / padded feature width for every layer
NUM_LAYERS = 4      # 3 hidden layers + output layer


def _round_up(x, m):
    return ((x + m - 1) // m) * m


def _mlp_kernel(x_ref, w_ref, b_ref, o_ref):
    # x_ref: (TILE_B, 128)   padded input tile
    # w_ref: (128, 4*128)    packed, lane-padded weights (layer l in cols [l*128,(l+1)*128))
    # b_ref: (8, 128)        packed, lane-padded biases  (layer l in row l)
    # o_ref: (TILE_B, 128)   lane-dense output slab (real output in column 0)
    x = x_ref[...]
    h = jnp.dot(x, w_ref[:, 0 * LANE:1 * LANE],
                preferred_element_type=jnp.float32) + b_ref[0:1, :]
    h = jnp.maximum(h, 0.0)
    h = jnp.dot(h, w_ref[:, 1 * LANE:2 * LANE],
                preferred_element_type=jnp.float32) + b_ref[1:2, :]
    h = jnp.maximum(h, 0.0)
    h = jnp.dot(h, w_ref[:, 2 * LANE:3 * LANE],
                preferred_element_type=jnp.float32) + b_ref[2:3, :]
    h = jnp.maximum(h, 0.0)
    out = jnp.dot(h, w_ref[:, 3 * LANE:4 * LANE],
                  preferred_element_type=jnp.float32) + b_ref[3:4, :]
    o_ref[...] = out.astype(o_ref.dtype)


def _pack_params(params):
    """Pack [(W_t, b), ...] (W_t = (in, out)) into one weight slab + one bias slab."""
    assert len(params) == NUM_LAYERS
    w_slab = jnp.zeros((LANE, NUM_LAYERS * LANE), jnp.float32)
    b_slab = jnp.zeros((8, LANE), jnp.float32)
    for l, (w, b) in enumerate(params):
        in_d, out_d = w.shape
        w_slab = w_slab.at[:in_d, l * LANE:l * LANE + out_d].set(w)
        b_slab = b_slab.at[l, :out_d].set(jnp.reshape(b, (-1,)))
    return w_slab, b_slab


def feedforward_net(x, params, tile_b=512):
    """x: (batch, input_dims) f32; params: list of (W_t, b) with W_t = (in, out)."""
    batch, in_dims = x.shape
    out_dims = params[-1][0].shape[1]

    # Batch tile: multiple of 8 (f32 sublane); cap at `tile_b` (512 keeps 2x-buffered
    # x/out tiles + weight slabs well under even v7x's 32 MiB scoped VMEM default).
    tb = min(tile_b, _round_up(batch, 8))
    b_pad = _round_up(batch, tb)

    # Lane-pad the input to 128 features and pad the batch to a whole number of tiles.
    x_pad = jnp.zeros((b_pad, LANE), jnp.float32).at[:batch, :in_dims].set(x)
    w_slab, b_slab = _pack_params(params)

    out = pl.pallas_call(
        _mlp_kernel,
        out_shape=jax.ShapeDtypeStruct((b_pad, LANE), jnp.float32),
        grid=(b_pad // tb,),
        in_specs=[
            pl.BlockSpec((tb, LANE), lambda i: (i, 0)),                 # x tile
            pl.BlockSpec((LANE, NUM_LAYERS * LANE), lambda i: (0, 0)),  # weight slab (resident)
            pl.BlockSpec((8, LANE), lambda i: (0, 0)),                  # bias slab (resident)
        ],
        out_specs=pl.BlockSpec((tb, LANE), lambda i: (i, 0)),
        compiler_params=pltpu.CompilerParams(
            dimension_semantics=("parallel",)),
    )(x_pad, w_slab, b_slab)

    return out[:batch, :out_dims]


def xavier_uniform(key, fan_in, fan_out):
    # Matches torch.nn.init.xavier_uniform_ with gain=1; returns (in, out) (pre-transposed).
    bound = (6.0 / (fan_in + fan_out)) ** 0.5
    return jax.random.uniform(key, (fan_in, fan_out), jnp.float32, -bound, bound)


def init_params(key, input_dims=5, layer_width=(10, 10, 10), output_dims=1):
    dims = [input_dims] + list(layer_width)
    params = []
    keys = jax.random.split(key, len(dims))
    for i in range(len(layer_width)):
        w = xavier_uniform(keys[i], dims[i], dims[i + 1])
        b = jnp.zeros((1, dims[i + 1]), jnp.float32)
        params.append((w, b))
    wo = xavier_uniform(keys[-1], dims[-1], output_dims)
    bo = jnp.zeros((1, output_dims), jnp.float32)
    params.append((wo, bo))
    return params


def reference(x, params):
    h = x
    for (w, b) in params[:-1]:
        h = jnp.maximum(h @ w + b, 0.0)
    wo, bo = params[-1]
    return h @ wo + bo


if __name__ == "__main__":
    key = jax.random.PRNGKey(0)
    k_x, k_p = jax.random.split(key)

    batch, input_dims = 8, 5
    x = jax.random.normal(k_x, (batch, input_dims), jnp.float32)
    params = init_params(k_p, input_dims=input_dims, layer_width=(10, 10, 10), output_dims=1)

    out = feedforward_net(x, params)
    out = jax.block_until_ready(out)

    ref = reference(x, params)
    assert out.shape == (batch, 1), out.shape
    assert jnp.allclose(out, ref, atol=1e-5, rtol=1e-5), "mismatch vs reference"

    print("KERNEL_OK")
</pallas_src>

<mosaic_0001>
module attributes {stable_mosaic.version = 11 : i64} {
  func.func @_mlp_kernel(%arg0: i32, %arg1: memref<8x128xf32, #tpu.memory_space<vmem>>, %arg2: memref<128x512xf32, #tpu.memory_space<vmem>>, %arg3: memref<8x128xf32, #tpu.memory_space<vmem>>, %arg4: memref<8x128xf32, #tpu.memory_space<vmem>>) attributes {dimension_semantics = [#tpu.dimension_semantics<parallel>], iteration_bounds = array<i64: 1>, scalar_prefetch = 0 : i64, scratch_operands = 0 : i64, tpu.core_type = #tpu.core_type<tc>, window_params = [{transform_indices = @transform_0, window_bounds = array<i64: 8, 128>}, {pipeline_mode = #tpu.pipeline_mode<synchronous>, transform_indices = @transform_1, window_bounds = array<i64: 128, 512>}, {pipeline_mode = #tpu.pipeline_mode<synchronous>, transform_indices = @transform_2, window_bounds = array<i64: 8, 128>}, {transform_indices = @transform_3, window_bounds = array<i64: 8, 128>}]} {
    %c0 = arith.constant 0 : index
    %c0_0 = arith.constant 0 : index
    %0 = vector.load %arg1[%c0, %c0_0] : memref<8x128xf32, #tpu.memory_space<vmem>>, vector<8x128xf32>
    %c0_1 = arith.constant 0 : index
    %c0_2 = arith.constant 0 : index
    %1 = vector.load %arg2[%c0_1, %c0_2] : memref<128x512xf32, #tpu.memory_space<vmem>>, vector<128x128xf32>
    %cst = arith.constant dense<0.000000e+00> : vector<8x128xf32>
    %2 = tpu.matmul %0, %1, %cst {dimension_numbers = #tpu.dot_dimension_numbers<[1], [0], [0], [1], [0, 0, 1, 1], [], []>} : vector<8x128xf32>, vector<128x128xf32>, vector<8x128xf32> -> vector<8x128xf32>
    %c0_3 = arith.constant 0 : index
    %c0_4 = arith.constant 0 : index
    %3 = vector.load %arg3[%c0_3, %c0_4] : memref<8x128xf32, #tpu.memory_space<vmem>>, vector<1x128xf32>
    %4 = vector.broadcast %3 : vector<1x128xf32> to vector<8x128xf32>
    %5 = arith.addf %2, %4 : vector<8x128xf32>
    %cst_5 = arith.constant 0.000000e+00 : f32
    %6 = vector.broadcast %cst_5 : f32 to vector<8x128xf32>
    %7 = arith.maximumf %5, %6 : vector<8x128xf32>
    %c0_6 = arith.constant 0 : index
    %c128 = arith.constant 128 : index
    %8 = vector.load %arg2[%c0_6, %c128] : memref<128x512xf32, #tpu.memory_space<vmem>>, vector<128x128xf32>
    %cst_7 = arith.constant dense<0.000000e+00> : vector<8x128xf32>
    %9 = tpu.matmul %7, %8, %cst_7 {dimension_numbers = #tpu.dot_dimension_numbers<[1], [0], [0], [1], [0, 0, 1, 1], [], []>} : vector<8x128xf32>, vector<128x128xf32>, vector<8x128xf32> -> vector<8x128xf32>
    %c1 = arith.constant 1 : index
    %c0_8 = arith.constant 0 : index
    %10 = vector.load %arg3[%c1, %c0_8] : memref<8x128xf32, #tpu.memory_space<vmem>>, vector<1x128xf32>
    %11 = vector.broadcast %10 : vector<1x128xf32> to vector<8x128xf32>
    %12 = arith.addf %9, %11 : vector<8x128xf32>
    %cst_9 = arith.constant 0.000000e+00 : f32
    %13 = vector.broadcast %cst_9 : f32 to vector<8x128xf32>
    %14 = arith.maximumf %12, %13 : vector<8x128xf32>
    %c0_10 = arith.constant 0 : index
    %c256 = arith.constant 256 : index
    %15 = vector.load %arg2[%c0_10, %c256] : memref<128x512xf32, #tpu.memory_space<vmem>>, vector<128x128xf32>
    %cst_11 = arith.constant dense<0.000000e+00> : vector<8x128xf32>
    %16 = tpu.matmul %14, %15, %cst_11 {dimension_numbers = #tpu.dot_dimension_numbers<[1], [0], [0], [1], [0, 0, 1, 1], [], []>} : vector<8x128xf32>, vector<128x128xf32>, vector<8x128xf32> -> vector<8x128xf32>
    %c2 = arith.constant 2 : index
    %c0_12 = arith.constant 0 : index
    %17 = vector.load %arg3[%c2, %c0_12] : memref<8x128xf32, #tpu.memory_space<vmem>>, vector<1x128xf32>
    %18 = vector.broadcast %17 : vector<1x128xf32> to vector<8x128xf32>
    %19 = arith.addf %16, %18 : vector<8x128xf32>
    %cst_13 = arith.constant 0.000000e+00 : f32
    %20 = vector.broadcast %cst_13 : f32 to vector<8x128xf32>
    %21 = arith.maximumf %19, %20 : vector<8x128xf32>
    %c0_14 = arith.constant 0 : index
    %c384 = arith.constant 384 : index
    %22 = vector.load %arg2[%c0_14, %c384] : memref<128x512xf32, #tpu.memory_space<vmem>>, vector<128x128xf32>
    %cst_15 = arith.constant dense<0.000000e+00> : vector<8x128xf32>
    %23 = tpu.matmul %21, %22, %cst_15 {dimension_numbers = #tpu.dot_dimension_numbers<[1], [0], [0], [1], [0, 0, 1, 1], [], []>} : vector<8x128xf32>, vector<128x128xf32>, vector<8x128xf32> -> vector<8x128xf32>
    %c3 = arith.constant 3 : index
    %c0_16 = arith.constant 0 : index
    %24 = vector.load %arg3[%c3, %c0_16] : memref<8x128xf32, #tpu.memory_space<vmem>>, vector<1x128xf32>
    %25 = vector.broadcast %24 : vector<1x128xf32> to vector<8x128xf32>
    %26 = arith.addf %23, %25 : vector<8x128xf32>
    %c0_17 = arith.constant 0 : index
    %c0_18 = arith.constant 0 : index
    %27 = vector.load %arg4[%c0_17, %c0_18] : memref<8x128xf32, #tpu.memory_space<vmem>>, vector<8x128xf32>
    tpu.vector_store %arg4[%c0_17, %c0_18], %26 {strides = array<i32>} : memref<8x128xf32, #tpu.memory_space<vmem>>, vector<8x128xf32>,
    return
  }
  func.func @transform_0(%arg0: i32) -> (i32, i32) {
    %c0_i32 = arith.constant 0 : i32
    %c0_i32_0 = arith.constant 0 : i32
    return %arg0, %c0_i32 : i32, i32
  }
  func.func @transform_1(%arg0: i32) -> (i32, i32) {
    %c0_i32 = arith.constant 0 : i32
    %c0_i32_0 = arith.constant 0 : i32
    %c0_i32_1 = arith.constant 0 : i32
    return %c0_i32, %c0_i32_0 : i32, i32
  }
  func.func @transform_2(%arg0: i32) -> (i32, i32) {
    %c0_i32 = arith.constant 0 : i32
    %c0_i32_0 = arith.constant 0 : i32
    %c0_i32_1 = arith.constant 0 : i32
    return %c0_i32, %c0_i32_0 : i32, i32
  }
  func.func @transform_3(%arg0: i32) -> (i32, i32) {
    %c0_i32 = arith.constant 0 : i32
    %c0_i32_0 = arith.constant 0 : i32
    return %arg0, %c0_i32 : i32, i32
  }
}

</mosaic_0001>

<bundles_post_ra>
// kernel: tpu_custom_call.1
= control target key start
LH: loop header
LB: loop body
LE: loop exit
PB: predicated region body
PF: predicated region fallthrough
CT: control target
= control target key end

     0   :  { %8 = vsyncpa [#allocation3], 0  ;;  %s383_s0 = inlined_call_operand.hbm [shape: f32[8,128], index: 0, kind: input, shape index: {}]   ;;  %s384_s1 = inlined_call_operand.hbm [shape: f32[128,512], index: 1, kind: input, shape index: {}]   ;;  %s385_s2 = inlined_call_operand.hbm [shape: f32[8,128], index: 2, kind: input, shape index: {}]   ;;  %s386_s3 = inlined_call_operand.hbm [shape: f32[8,128], index: 3, kind: output, shape index: {}]  }
   0x1   :  { %9 = vsyncpa [#allocation6], 0  ;;  %s26_s14 = sshll.u32 %s384_s1, 4  ;;  %s27_s14 = int_to_ptr.hbm [resolvable:$true] %s26_s14 }
   0x2   :  { %10 = vsyncpa [#allocation4], 0  ;;  %s345_s15 = smov [#allocation5]   ;;  %s16_s19 = sshll.u32 %s383_s0, 4  ;;  %s17_s19 = int_to_ptr.hbm [resolvable:$true] %s16_s19 }
   0x3   :  { %s28_s16 = sshll.u32 %s345_s15, 4  ;;  %s346_s20 = smov 512   ;;  %s29_s16 = int_to_ptr.vmem [resolvable:$true] %s28_s16 }
   0x4   :  { %s347_s21 = smov 32   ;;  %s348_s22 = smov [#allocation2]  }
   0x5   :  { %34 = dma.hbm_to_vmem [thread:$0]  %s27_s14, 8192, %s29_s16, [#allocation6], %s346_s20, %s346_s20, %s347_s21  }
   0x6   :  { %s18_s23 = sshll.u32 %s348_s22, 4  ;;  %s40_s26 = sshll.u32 %s385_s2, 4  ;;  %s19_s23 = int_to_ptr.vmem [resolvable:$true] %s18_s23  ;;  %s41_s26 = int_to_ptr.hbm [resolvable:$true] %s40_s26 }
   0x7   :  { %21 = dma.hbm_to_vmem [thread:$0]  %s17_s19, 128, %s19_s23, [#allocation3]  }
   0x8   :  { %s349_s1 = smov [#allocation7]  }
   0x9   :  { %s42_s27 = sshll.u32 %s349_s1, 4  ;;  %s43_s27 = int_to_ptr.vmem [resolvable:$true] %s42_s27 }
   0xa   :  { %45 = dma.hbm_to_vmem [thread:$0]  %s41_s26, 128, %s43_s27, [#allocation6]  }
   0xb   :  { %339 = dma.done.wait [#allocation3], 128  }
   0xc   :  { %340 = vsyncadd [#allocation3], 4294967168 }
   0xd   :  { %341 = dma.done.wait [#allocation6], 8320  }
   0xe   :  { %342 = vsyncadd [#allocation6], 4294958976  ;;  %v74_v0 = vld [vmem:[#allocation5 + $0x1e0] sm:$0xff]  ;;  %v113_v4 = vld [vmem:[#allocation5 + $0x1e8] sm:$0xff]  ;;  %s350_s0 = smov [#allocation8]   ;;  %s222_s30 = sshll.u32 %s386_s3, 4  ;;  %s223_s30 = int_to_ptr.hbm [resolvable:$true] %s222_s30 }
   0xf   :  { %v73_v1 = vld [vmem:[#allocation5 + $0x1c0] sm:$0xff]  ;;  %77 = vmatpush.msra.mxu0 %v74_v0  ;;  %116 = vmatpush.msra.mxu1 %v113_v4  ;;  %v112_v6 = vld [vmem:[#allocation5 + $0x1c8] sm:$0xff]  ;;  %v58_v29 = vld [vmem:[#allocation2] sm:$0xff]  ;;  %s220_s2 = sshll.u32 %s350_s0, 4  ;;  %s221_s2 = int_to_ptr.vmem [resolvable:$true] %s220_s2 }
  0x10   :  { %v72_v2 = vld [vmem:[#allocation5 + $0x1a0] sm:$0xff]  ;;  %v111_v7 = vld [vmem:[#allocation5 + $0x1a8] sm:$0xff]  ;;  %v152_v33 = vld [vmem:[#allocation5 + $0x1f0] sm:$0xff] }
  0x11   :  { %78 = vmatpush.msra.mxu0 %v73_v1  ;;  %v71_v3 = vld [vmem:[#allocation5 + $0x180] sm:$0xff]  ;;  %117 = vmatpush.msra.mxu1 %v112_v6  ;;  %v110_v9 = vld [vmem:[#allocation5 + $0x188] sm:$0xff]  ;;  %v151_v34 = vld [vmem:[#allocation5 + $0x1d0] sm:$0xff] }
  0x12   :  { %v70_v5 = vld [vmem:[#allocation5 + $0x160] sm:$0xff]  ;;  %v109_v11 = vld [vmem:[#allocation5 + $0x168] sm:$0xff]  ;;  %155 = vmatpush.msra.mxu2 %v152_v33  ;;  %v150_v35 = vld [vmem:[#allocation5 + $0x1b0] sm:$0xff] }
  0x13   :  { %79 = vmatpush.msra.mxu0 %v72_v2  ;;  %v69_v8 = vld [vmem:[#allocation5 + $0x140] sm:$0xff]  ;;  %118 = vmatpush.msra.mxu1 %v111_v7  ;;  %v108_v13 = vld [vmem:[#allocation5 + $0x148] sm:$0xff]  ;;  %v149_v36 = vld [vmem:[#allocation5 + $0x190] sm:$0xff] }
  0x14   :  { %v68_v10 = vld [vmem:[#allocation5 + $0x120] sm:$0xff]  ;;  %v107_v15 = vld [vmem:[#allocation5 + $0x128] sm:$0xff]  ;;  %156 = vmatpush.msra.mxu2 %v151_v34  ;;  %v148_v37 = vld [vmem:[#allocation5 + $0x170] sm:$0xff] }
  0x15   :  { %80 = vmatpush.msra.mxu0 %v71_v3  ;;  %v67_v12 = vld [vmem:[#allocation5 + $0x100] sm:$0xff]  ;;  %119 = vmatpush.msra.mxu1 %v110_v9  ;;  %v106_v17 = vld [vmem:[#allocation5 + $0x108] sm:$0xff]  ;;  %v147_v38 = vld [vmem:[#allocation5 + $0x150] sm:$0xff] }
  0x16   :  { %v66_v14 = vld [vmem:[#allocation5 + $0xe0] sm:$0xff]  ;;  %v105_v19 = vld [vmem:[#allocation5 + $0xe8] sm:$0xff]  ;;  %157 = vmatpush.msra.mxu2 %v150_v35  ;;  %v146_v39 = vld [vmem:[#allocation5 + $0x130] sm:$0xff] }
  0x17   :  { %81 = vmatpush.msra.mxu0 %v70_v5  ;;  %120 = vmatpush.msra.mxu1 %v109_v11  ;;  %v65_v16 = vld [vmem:[#allocation5 + $0xc0] sm:$0xff]  ;;  %v104_v21 = vld [vmem:[#allocation5 + $0xc8] sm:$0xff]  ;;  %v145_v40 = vld [vmem:[#allocation5 + $0x110] sm:$0xff] }
  0x18   :  { %v64_v18 = vld [vmem:[#allocation5 + $0xa0] sm:$0xff]  ;;  %v103_v23 = vld [vmem:[#allocation5 + $0xa8] sm:$0xff]  ;;  %158 = vmatpush.msra.mxu2 %v149_v36  ;;  %v144_v41 = vld [vmem:[#allocation5 + $0xf0] sm:$0xff] }
  0x19   :  { %82 = vmatpush.msra.mxu0 %v69_v8  ;;  %121 = vmatpush.msra.mxu1 %v108_v13  ;;  %v63_v20 = vld [vmem:[#allocation5 + $0x80] sm:$0xff]  ;;  %v102_v25 = vld [vmem:[#allocation5 + $0x88] sm:$0xff]  ;;  %v143_v42 = vld [vmem:[#allocation5 + $0xd0] sm:$0xff] }
  0x1a   :  { %v62_v22 = vld [vmem:[#allocation5 + $0x60] sm:$0xff]  ;;  %v101_v27 = vld [vmem:[#allocation5 + $0x68] sm:$0xff]  ;;  %159 = vmatpush.msra.mxu2 %v148_v37  ;;  %v142_v43 = vld [vmem:[#allocation5 + $0xb0] sm:$0xff] }
  0x1b   :  { %83 = vmatpush.msra.mxu0 %v68_v10  ;;  %122 = vmatpush.msra.mxu1 %v107_v15  ;;  %v61_v24 = vld [vmem:[#allocation5 + $0x40] sm:$0xff]  ;;  %v100_v30 = vld [vmem:[#allocation5 + $0x48] sm:$0xff]  ;;  %v141_v44 = vld [vmem:[#allocation5 + $0x90] sm:$0xff] }
  0x1c   :  { %v60_v26 = vld [vmem:[#allocation5 + $0x20] sm:$0xff]  ;;  %v99_v31 = vld [vmem:[#allocation5 + $0x28] sm:$0xff]  ;;  %160 = vmatpush.msra.mxu2 %v147_v38  ;;  %v140_v45 = vld [vmem:[#allocation5 + $0x70] sm:$0xff] }
  0x1d   :  { %84 = vmatpush.msra.mxu0 %v67_v12  ;;  %123 = vmatpush.msra.mxu1 %v106_v17  ;;  %v59_v28 = vld [vmem:[#allocation5] sm:$0xff]  ;;  %v98_v32 = vld [vmem:[#allocation5 + $0x8] sm:$0xff]  ;;  %v139_v50 = vld [vmem:[#allocation5 + $0x50] sm:$0xff] }
  0x1e   :  { %161 = vmatpush.msra.mxu2 %v146_v39  ;;  %v239_v46 = vld [vmem:[#allocation7] ss:$0 sm:$0xff]  ;;  %v138_v51 = vld [vmem:[#allocation5 + $0x30] sm:$0xff]  ;;  %v191_v53 = vld [vmem:[#allocation5 + $0x1f8] sm:$0xff] }
  0x1f   :  { %85 = vmatpush.msra.mxu0 %v66_v14  ;;  %124 = vmatpush.msra.mxu1 %v105_v19  ;;  %v137_v52 = vld [vmem:[#allocation5 + $0x10] sm:$0xff]  ;;  %v190_v54 = vld [vmem:[#allocation5 + $0x1d8] sm:$0xff]  ;;  %v240_v2 = vld [vmem:[#allocation7 + $0x1] ss:$0 sm:$0xff] }
  0x20   :  { %162 = vmatpush.msra.mxu2 %v145_v40  ;;  %194 = vmatpush.msra.mxu3 %v191_v53  ;;  %v189_v55 = vld [vmem:[#allocation5 + $0x1b8] sm:$0xff]  ;;  %v241_v9 = vld [vmem:[#allocation7 + $0x2] ss:$0 sm:$0xff]  ;;  %v242_v13 = vld [vmem:[#allocation7 + $0x3] ss:$0 sm:$0xff] }
  0x21   :  { %86 = vmatpush.msra.mxu0 %v65_v16  ;;  %125 = vmatpush.msra.mxu1 %v104_v21  ;;  %v188_v56 = vld [vmem:[#allocation5 + $0x198] sm:$0xff] }
  0x22   :  { %163 = vmatpush.msra.mxu2 %v144_v41  ;;  %195 = vmatpush.msra.mxu3 %v190_v54  ;;  %v187_v57 = vld [vmem:[#allocation5 + $0x178] sm:$0xff] }
  0x23   :  { %87 = vmatpush.msra.mxu0 %v64_v18  ;;  %126 = vmatpush.msra.mxu1 %v103_v23  ;;  %v186_v58 = vld [vmem:[#allocation5 + $0x158] sm:$0xff] }
  0x24   :  { %164 = vmatpush.msra.mxu2 %v143_v42  ;;  %196 = vmatpush.msra.mxu3 %v189_v55  ;;  %v185_v59 = vld [vmem:[#allocation5 + $0x138] sm:$0xff] }
  0x25   :  { %88 = vmatpush.msra.mxu0 %v63_v20  ;;  %127 = vmatpush.msra.mxu1 %v102_v25  ;;  %v184_v60 = vld [vmem:[#allocation5 + $0x118] sm:$0xff] }
  0x26   :  { %165 = vmatpush.msra.mxu2 %v142_v43  ;;  %197 = vmatpush.msra.mxu3 %v188_v56  ;;  %v183_v61 = vld [vmem:[#allocation5 + $0xf8] sm:$0xff] }
  0x27   :  { %89 = vmatpush.msra.mxu0 %v62_v22  ;;  %128 = vmatpush.msra.mxu1 %v101_v27  ;;  %v182_v62 = vld [vmem:[#allocation5 + $0xd8] sm:$0xff] }
  0x28   :  { %166 = vmatpush.msra.mxu2 %v141_v44  ;;  %198 = vmatpush.msra.mxu3 %v187_v57  ;;  %v181_v63 = vld [vmem:[#allocation5 + $0xb8] sm:$0xff] }
  0x29   :  { %90 = vmatpush.msra.mxu0 %v61_v24  ;;  %129 = vmatpush.msra.mxu1 %v100_v30  ;;  %v180_v0 = vld [vmem:[#allocation5 + $0x98] sm:$0xff] }
  0x2a   :  { %167 = vmatpush.msra.mxu2 %v140_v45  ;;  %199 = vmatpush.msra.mxu3 %v186_v58  ;;  %v179_v1 = vld [vmem:[#allocation5 + $0x78] sm:$0xff] }
  0x2b   :  { %91 = vmatpush.msra.mxu0 %v60_v26  ;;  %130 = vmatpush.msra.mxu1 %v99_v31  ;;  %v178_v6 = vld [vmem:[#allocation5 + $0x58] sm:$0xff] }
  0x2c   :  { %168 = vmatpush.msra.mxu2 %v139_v50  ;;  %200 = vmatpush.msra.mxu3 %v185_v59  ;;  %v177_v7 = vld [vmem:[#allocation5 + $0x38] sm:$0xff] }
  0x2d   :  { %92 = vmatpush.msra.mxu0 %v59_v28  ;;  %131 = vmatpush.msra.mxu1 %v98_v32  ;;  %v176_v8 = vld [vmem:[#allocation5 + $0x18] sm:$0xff] }
  0x2e   :  { %93 = vmatmul.f32.vlgmr.msra.gmra.mxu0 %v58_v29  ;;  %169 = vmatpush.msra.mxu2 %v138_v51 }
  0x2f   :  { %201 = vmatpush.msra.mxu3 %v184_v60 }
  0x30   :  { %170 = vmatpush.msra.mxu2 %v137_v52 }
  0x31   :  { %202 = vmatpush.msra.mxu3 %v183_v61 }
  0x33   :  { %203 = vmatpush.msra.mxu3 %v182_v62 }
  0x35   :  { %204 = vmatpush.msra.mxu3 %v181_v63 }
  0x37   :  { %205 = vmatpush.msra.mxu3 %v180_v0 }
  0x39   :  { %206 = vmatpush.msra.mxu3 %v179_v1 }
  0x3b   :  { %207 = vmatpush.msra.mxu3 %v178_v6 }
  0x3d   :  { %208 = vmatpush.msra.mxu3 %v177_v7 }
  0x3f   :  { %209 = vmatpush.msra.mxu3 %v176_v8 }
  0xab   :  { %v94_v47 = vpop.f32.mrf.mxu0 }
  0xac   :  { %v95_v48 = vadd.f32 %v239_v46, %v94_v47 }
  0xae   :  { %v97_v49 = vmax.f32 %v95_v48, 0.0 }
  0xb0   :  { %132 = vmatmul.f32.vlgmr.msra.gmra.mxu1 %v97_v49 }
 0x12d   :  { %v133_v3 = vpop.f32.mrf.mxu1 }
 0x12e   :  { %v134_v4 = vadd.f32 %v240_v2, %v133_v3 }
 0x130   :  { %v136_v5 = vmax.f32 %v134_v4, 0.0 }
 0x132   :  { %171 = vmatmul.f32.vlgmr.msra.gmra.mxu2 %v136_v5 }
 0x1b5   :  { %v172_v10 = vpop.f32.mrf.mxu2 }
 0x1b6   :  { %v173_v11 = vadd.f32 %v241_v9, %v172_v10 }
 0x1b8   :  { %v175_v12 = vmax.f32 %v173_v11, 0.0 }
 0x1ba   :  { %210 = vmatmul.f32.vlgmr.msra.gmra.mxu3 %v175_v12 }
 0x23d   :  { %v211_v14 = vpop.f32.mrf.mxu3 }
 0x23e   :  { %v212_v15 = vadd.f32 %v242_v13, %v211_v14 }
 0x240   :  { %214 = vst [vmem:[#allocation8] sm:$0xff] %v212_v15 }
 0x241   :  { %225 = dma.vmem_to_hbm [thread:$0]  %s221_s2, 128, %s223_s30, [#allocation4]  }
 0x242   :  { %343 = dma.done.wait [#allocation4], 128  }
 0x243   :  { %344 = vsyncadd [#allocation4], 4294967168 }
 0x244   :  { %230 = vsyncpa [#allocation3], 1 }
 0x245   :  { %231 = vsyncpa [#allocation6], 1 }
 0x246   :  { %232 = vsyncpa [#allocation4], 1 }

</bundles_post_ra>
